<compile_context>
chip_gen: v7x
topology: tpu7x:2x2x1
jax: 0.10.0
libtpu: 0.0.40
codegen_flags: <defaults>
</compile_context>

<pallas_src>
import jax
import jax.numpy as jnp
from jax.experimental import pallas as pl
from jax.experimental.pallas import tpu as pltpu


def _copy_kernel(x_ref, o_ref):
    # Pure streaming copy: input and output blocks are layout-identical, so
    # this lowers to unmasked lane-dense loads/stores (masked only on the
    # ragged edge blocks).
    o_ref[...] = x_ref[...]


# Below this size the fixed dispatch + per-grid-step overhead dwarfs a pure
# metadata reshape, so we skip the kernel entirely.
_MIN_PALLAS_BYTES = 128 * 1024
# Per-block VMEM budget. Double-buffered in + out => 4 live blocks <= 8 MiB.
_BLOCK_BYTES = 2 * 1024 * 1024


def _choose_blocks(n, dim, itemsize):
    """Pick (tb, tl) respecting the (8,128)-or-full-dim rule and VMEM budget."""
    # Sublane packing unit: 8 for 4-byte, 16 for 2-byte, 32 for 1-byte dtypes.
    sub_unit = max(8, 32 // max(itemsize, 1))
    row_bytes = max(dim * itemsize, 1)
    rows_in_budget = _BLOCK_BYTES // row_bytes

    if dim <= 128 or rows_in_budget >= sub_unit:
        # Lane-full rows fit in the budget -> fully contiguous HBM DMAs.
        tl = dim                                   # full lane dim (always legal)
        if n <= sub_unit:
            tb = n                                 # full array dim (always legal)
        else:
            tb = min(n, max(rows_in_budget, sub_unit))
            tb = (tb // sub_unit) * sub_unit       # multiple of sublane unit
    else:
        # Rows too wide for VMEM budget: fixed lane tiles (multiple of 128).
        tb = n if n < sub_unit else sub_unit
        tl = (_BLOCK_BYTES // max(tb * itemsize, 1) // 128) * 128
        tl = max(min(tl, (dim // 128) * 128), 128)
    return tb, tl


def flatten(x, seq=False):
    """Pallas equivalent of Flatten().forward(x, seq=False)."""
    if seq:
        # TODO(synk): seq=True is ill-defined in the reference (double -1 view).
        raise NotImplementedError("seq=True branch is invalid in the reference module")

    n = x.shape[0]
    dim = 1
    for s in x.shape[1:]:
        dim *= s

    # Free, metadata-only flatten at the JAX level.
    x_flat = jnp.reshape(x, (n, dim))

    itemsize = jnp.dtype(x.dtype).itemsize
    total_bytes = n * dim * itemsize
    if total_bytes < _MIN_PALLAS_BYTES:
        # Copy elimination: reshape alone is the whole op for small tensors.
        return x_flat

    tb, tl = _choose_blocks(n, dim, itemsize)
    grid = (pl.cdiv(n, tb), pl.cdiv(dim, tl))

    return pl.pallas_call(
        _copy_kernel,
        out_shape=jax.ShapeDtypeStruct((n, dim), x.dtype),
        grid_spec=pltpu.PrefetchScalarGridSpec(
            num_scalar_prefetch=0,
            grid=grid,
            in_specs=[pl.BlockSpec((tb, tl), lambda i, j: (i, j))],
            out_specs=pl.BlockSpec((tb, tl), lambda i, j: (i, j)),
        ),
        # Donate the (temporary) flat input buffer to the output.
        input_output_aliases={0: 0},
        compiler_params=pltpu.CompilerParams(
            dimension_semantics=("parallel", "parallel"),
        ),
        cost_estimate=pl.CostEstimate(
            flops=0,
            transcendentals=0,
            bytes_accessed=2 * total_bytes,
        ),
    )(x_flat)


if __name__ == "__main__":
    key = jax.random.PRNGKey(0)

    # 1) Module-scale input (batch=2, channels=4, spatial=16): 8 KiB -> takes
    #    the metadata-only fast path (no HBM copy at all).
    x = jax.random.normal(key, (2, 4, 16, 16), dtype=jnp.float32)
    out = jax.block_until_ready(flatten(x))
    assert out.shape == (2, 4 * 16 * 16), out.shape
    assert out.dtype == x.dtype
    assert jnp.array_equal(out, x.reshape(x.shape[0], -1)), "mismatch (fast path)"

    # 2) Kernel path, single lane-full block (256 KiB, grid (1,1)).
    x2 = jax.random.normal(jax.random.PRNGKey(1), (16, 4, 32, 32), dtype=jnp.float32)
    out2 = jax.block_until_ready(flatten(x2))
    assert jnp.array_equal(out2, x2.reshape(16, -1)), "mismatch (kernel, single block)"

    # 3) Kernel path with a ragged sublane edge: n=18, tb=16 -> grid (2,1).
    x3 = jax.random.normal(jax.random.PRNGKey(2), (18, 4, 32, 32), dtype=jnp.float32)
    out3 = jax.block_until_ready(flatten(x3))
    assert jnp.array_equal(out3, x3.reshape(18, -1)), "mismatch (kernel, ragged edge)"

    # 4) Kernel path with a packed dtype (bf16, sublane unit 16).
    x4 = jax.random.normal(jax.random.PRNGKey(3), (16, 4, 32, 32)).astype(jnp.bfloat16)
    out4 = jax.block_until_ready(flatten(x4))
    assert out4.dtype == jnp.bfloat16
    assert jnp.array_equal(out4, x4.reshape(16, -1)), "mismatch (kernel, bf16)"

    print("KERNEL_OK")
</pallas_src>

<mosaic_0001>
module attributes {stable_mosaic.version = 11 : i64} {
  func.func @_copy_kernel(%arg0: i32, %arg1: i32, %arg2: memref<16x4096xf32, #tpu.memory_space<vmem>>, %arg3: memref<16x4096xf32, #tpu.memory_space<vmem>>) attributes {dimension_semantics = [#tpu.dimension_semantics<parallel>, #tpu.dimension_semantics<parallel>], iteration_bounds = array<i64: 1, 1>, scalar_prefetch = 0 : i64, scratch_operands = 0 : i64, tpu.core_type = #tpu.core_type<tc>, window_params = [{transform_indices = @transform_0, window_bounds = array<i64: 16, 4096>}, {transform_indices = @transform_1, window_bounds = array<i64: 16, 4096>}]} {
    %c0 = arith.constant 0 : index
    %c0_0 = arith.constant 0 : index
    %0 = vector.load %arg2[%c0, %c0_0] : memref<16x4096xf32, #tpu.memory_space<vmem>>, vector<16x4096xf32>
    %c0_1 = arith.constant 0 : index
    %c0_2 = arith.constant 0 : index
    %1 = vector.load %arg3[%c0_1, %c0_2] : memref<16x4096xf32, #tpu.memory_space<vmem>>, vector<16x4096xf32>
    tpu.vector_store %arg3[%c0_1, %c0_2], %0 {strides = array<i32>} : memref<16x4096xf32, #tpu.memory_space<vmem>>, vector<16x4096xf32>,
    return
  }
  func.func @transform_0(%arg0: i32, %arg1: i32) -> (i32, i32) {
    %c0_i32 = arith.constant 0 : i32
    return %arg0, %arg1 : i32, i32
  }
  func.func @transform_1(%arg0: i32, %arg1: i32) -> (i32, i32) {
    %c0_i32 = arith.constant 0 : i32
    return %arg0, %arg1 : i32, i32
  }
}

</mosaic_0001>

<bundles_post_ra>
// kernel: tpu_custom_call.1
= control target key start
LH: loop header
LB: loop body
LE: loop exit
PB: predicated region body
PF: predicated region fallthrough
CT: control target
= control target key end

     0   :  { %6 = vsyncpa [#allocation3], 0  ;;  %s264_s0 = inlined_call_operand.hbm [shape: f32[16,4096], index: 0, kind: input, shape index: {}, may-alias: {0,1}]   ;;  %s265_s1 = inlined_call_operand.hbm [shape: f32[16,4096], index: 1, kind: output, shape index: {}, may-alias: {0,1}]  }
   0x1   :  { %7 = vsyncpa [#allocation4], 0  ;;  %s220_s6 = smov [#allocation2]   ;;  %s172_s10 = scalar_lea.hbm %s264_s0, 8192 }
   0x2   :  { %s13_s7 = sshll.u32 %s220_s6, 4  ;;  %p173_p0 = scmp.ne.s32.totalorder %s264_s0, %s172_s10  ;;  %s14_s7 = int_to_ptr.vmem [resolvable:$true] %s13_s7 }
   0x3   :  { %p176_p1 = scmp.lt.u32.totalorder %s172_s10, %s264_s0 }
   0x5   :  { %p178_p2 = pnand %p176_p1, %p173_p0 }
   0x7   :  { %181 = shalt.err (!%p178_p2)
}
   0x8   :  { %s182_s15 = scalar_lea.vmem %s14_s7, 8192  ;;  %p187_p4 = scmp.lt.s32.totalorder %s14_s7, %s14_s7 }
   0x9   :  { %p183_p3 = scmp.ne.s32.totalorder %s14_s7, %s182_s15  ;;  %p188_p5 = scmp.lt.s32.totalorder %s182_s15, %s182_s15 }
   0xb   :  { %p189_p6 = por %p188_p5, %p187_p4 }
   0xd   :  { %p190_p7 = pnand %p189_p6, %p183_p3 }
   0xf   :  { %193 = shalt.err (!%p190_p7)
}
  0x10   :  { %s221_s16 = smov 4096   ;;  %s222_s17 = smov 256  }
  0x11   :  { %19 = dma.hbm_to_vmem [thread:$0]  %s264_s0, 8192, %s14_s7, [#allocation3], %s221_s16, %s221_s16, %s222_s17  }
  0x12   :  { %216 = dma.done.wait [#allocation3], 8192  }
  0x13   :  { %217 = vsyncadd [#allocation3], 4294959104  ;;  %v23_v0 = vld [vmem:[#allocation2] sm:$0xff]  ;;  %v24_v1 = vld [vmem:[#allocation2 + $0x8] sm:$0xff]  ;;  %s223_s0 = smov [#allocation5]  }
  0x14   :  { %v25_v2 = vld [vmem:[#allocation2 + $0x10] sm:$0xff]  ;;  %87 = vst [vmem:[#allocation5] sm:$0xff] %v23_v0  ;;  %88 = vst [vmem:[#allocation5 + $0x8] sm:$0xff] %v24_v1  ;;  %v26_v3 = vld [vmem:[#allocation2 + $0x18] sm:$0xff]  ;;  %s156_s20 = sshll.u32 %s223_s0, 4  ;;  %s157_s20 = int_to_ptr.vmem [resolvable:$true] %s156_s20 }
  0x15   :  { %89 = vst [vmem:[#allocation5 + $0x10] sm:$0xff] %v25_v2  ;;  %v27_v4 = vld [vmem:[#allocation2 + $0x20] sm:$0xff]  ;;  %v28_v5 = vld [vmem:[#allocation2 + $0x28] sm:$0xff]  ;;  %90 = vst [vmem:[#allocation5 + $0x18] sm:$0xff] %v26_v3  ;;  %s194_s21 = scalar_lea.vmem %s157_s20, 8192  ;;  %p199_p9 = scmp.lt.s32.totalorder %s157_s20, %s157_s20 }
  0x16   :  { %91 = vst [vmem:[#allocation5 + $0x20] sm:$0xff] %v27_v4  ;;  %92 = vst [vmem:[#allocation5 + $0x28] sm:$0xff] %v28_v5  ;;  %v29_v6 = vld [vmem:[#allocation2 + $0x30] sm:$0xff]  ;;  %v30_v7 = vld [vmem:[#allocation2 + $0x38] sm:$0xff]  ;;  %p195_p8 = scmp.ne.s32.totalorder %s157_s20, %s194_s21  ;;  %p200_p10 = scmp.lt.s32.totalorder %s194_s21, %s194_s21 }
  0x17   :  { %v31_v8 = vld [vmem:[#allocation2 + $0x40] sm:$0xff]  ;;  %93 = vst [vmem:[#allocation5 + $0x30] sm:$0xff] %v29_v6  ;;  %94 = vst [vmem:[#allocation5 + $0x38] sm:$0xff] %v30_v7  ;;  %v32_v9 = vld [vmem:[#allocation2 + $0x48] sm:$0xff] }
  0x18   :  { %95 = vst [vmem:[#allocation5 + $0x40] sm:$0xff] %v31_v8  ;;  %v33_v10 = vld [vmem:[#allocation2 + $0x50] sm:$0xff]  ;;  %v34_v11 = vld [vmem:[#allocation2 + $0x58] sm:$0xff]  ;;  %96 = vst [vmem:[#allocation5 + $0x48] sm:$0xff] %v32_v9  ;;  %p201_p11 = por %p200_p10, %p199_p9 }
  0x19   :  { %97 = vst [vmem:[#allocation5 + $0x50] sm:$0xff] %v33_v10  ;;  %98 = vst [vmem:[#allocation5 + $0x58] sm:$0xff] %v34_v11  ;;  %v35_v12 = vld [vmem:[#allocation2 + $0x60] sm:$0xff]  ;;  %v36_v13 = vld [vmem:[#allocation2 + $0x68] sm:$0xff] }
  0x1a   :  { %v37_v14 = vld [vmem:[#allocation2 + $0x70] sm:$0xff]  ;;  %99 = vst [vmem:[#allocation5 + $0x60] sm:$0xff] %v35_v12  ;;  %100 = vst [vmem:[#allocation5 + $0x68] sm:$0xff] %v36_v13  ;;  %v38_v15 = vld [vmem:[#allocation2 + $0x78] sm:$0xff]  ;;  %p202_p12 = pnand %p201_p11, %p195_p8 }
  0x1b   :  { %101 = vst [vmem:[#allocation5 + $0x70] sm:$0xff] %v37_v14  ;;  %v39_v16 = vld [vmem:[#allocation2 + $0x80] sm:$0xff]  ;;  %v40_v17 = vld [vmem:[#allocation2 + $0x88] sm:$0xff]  ;;  %102 = vst [vmem:[#allocation5 + $0x78] sm:$0xff] %v38_v15 }
  0x1c   :  { %103 = vst [vmem:[#allocation5 + $0x80] sm:$0xff] %v39_v16  ;;  %104 = vst [vmem:[#allocation5 + $0x88] sm:$0xff] %v40_v17  ;;  %v41_v18 = vld [vmem:[#allocation2 + $0x90] sm:$0xff]  ;;  %v42_v19 = vld [vmem:[#allocation2 + $0x98] sm:$0xff] }
  0x1d   :  { %v43_v20 = vld [vmem:[#allocation2 + $0xa0] sm:$0xff]  ;;  %105 = vst [vmem:[#allocation5 + $0x90] sm:$0xff] %v41_v18  ;;  %106 = vst [vmem:[#allocation5 + $0x98] sm:$0xff] %v42_v19  ;;  %v44_v21 = vld [vmem:[#allocation2 + $0xa8] sm:$0xff] }
  0x1e   :  { %107 = vst [vmem:[#allocation5 + $0xa0] sm:$0xff] %v43_v20  ;;  %v45_v22 = vld [vmem:[#allocation2 + $0xb0] sm:$0xff]  ;;  %v46_v23 = vld [vmem:[#allocation2 + $0xb8] sm:$0xff]  ;;  %108 = vst [vmem:[#allocation5 + $0xa8] sm:$0xff] %v44_v21 }
  0x1f   :  { %109 = vst [vmem:[#allocation5 + $0xb0] sm:$0xff] %v45_v22  ;;  %110 = vst [vmem:[#allocation5 + $0xb8] sm:$0xff] %v46_v23  ;;  %v47_v24 = vld [vmem:[#allocation2 + $0xc0] sm:$0xff]  ;;  %v48_v25 = vld [vmem:[#allocation2 + $0xc8] sm:$0xff] }
  0x20   :  { %v49_v26 = vld [vmem:[#allocation2 + $0xd0] sm:$0xff]  ;;  %111 = vst [vmem:[#allocation5 + $0xc0] sm:$0xff] %v47_v24  ;;  %112 = vst [vmem:[#allocation5 + $0xc8] sm:$0xff] %v48_v25  ;;  %v50_v27 = vld [vmem:[#allocation2 + $0xd8] sm:$0xff] }
  0x21   :  { %113 = vst [vmem:[#allocation5 + $0xd0] sm:$0xff] %v49_v26  ;;  %v51_v28 = vld [vmem:[#allocation2 + $0xe0] sm:$0xff]  ;;  %v52_v29 = vld [vmem:[#allocation2 + $0xe8] sm:$0xff]  ;;  %114 = vst [vmem:[#allocation5 + $0xd8] sm:$0xff] %v50_v27 }
  0x22   :  { %115 = vst [vmem:[#allocation5 + $0xe0] sm:$0xff] %v51_v28  ;;  %116 = vst [vmem:[#allocation5 + $0xe8] sm:$0xff] %v52_v29  ;;  %v53_v30 = vld [vmem:[#allocation2 + $0xf0] sm:$0xff]  ;;  %v54_v31 = vld [vmem:[#allocation2 + $0xf8] sm:$0xff] }
  0x23   :  { %v55_v32 = vld [vmem:[#allocation2 + $0x100] sm:$0xff]  ;;  %117 = vst [vmem:[#allocation5 + $0xf0] sm:$0xff] %v53_v30  ;;  %118 = vst [vmem:[#allocation5 + $0xf8] sm:$0xff] %v54_v31  ;;  %v56_v33 = vld [vmem:[#allocation2 + $0x108] sm:$0xff] }
  0x24   :  { %119 = vst [vmem:[#allocation5 + $0x100] sm:$0xff] %v55_v32  ;;  %v57_v34 = vld [vmem:[#allocation2 + $0x110] sm:$0xff]  ;;  %v58_v35 = vld [vmem:[#allocation2 + $0x118] sm:$0xff]  ;;  %120 = vst [vmem:[#allocation5 + $0x108] sm:$0xff] %v56_v33 }
  0x25   :  { %121 = vst [vmem:[#allocation5 + $0x110] sm:$0xff] %v57_v34  ;;  %122 = vst [vmem:[#allocation5 + $0x118] sm:$0xff] %v58_v35  ;;  %v59_v36 = vld [vmem:[#allocation2 + $0x120] sm:$0xff]  ;;  %v60_v37 = vld [vmem:[#allocation2 + $0x128] sm:$0xff] }
  0x26   :  { %v61_v38 = vld [vmem:[#allocation2 + $0x130] sm:$0xff]  ;;  %123 = vst [vmem:[#allocation5 + $0x120] sm:$0xff] %v59_v36  ;;  %124 = vst [vmem:[#allocation5 + $0x128] sm:$0xff] %v60_v37  ;;  %v62_v39 = vld [vmem:[#allocation2 + $0x138] sm:$0xff] }
  0x27   :  { %125 = vst [vmem:[#allocation5 + $0x130] sm:$0xff] %v61_v38  ;;  %v63_v40 = vld [vmem:[#allocation2 + $0x140] sm:$0xff]  ;;  %v64_v41 = vld [vmem:[#allocation2 + $0x148] sm:$0xff]  ;;  %126 = vst [vmem:[#allocation5 + $0x138] sm:$0xff] %v62_v39 }
  0x28   :  { %127 = vst [vmem:[#allocation5 + $0x140] sm:$0xff] %v63_v40  ;;  %128 = vst [vmem:[#allocation5 + $0x148] sm:$0xff] %v64_v41  ;;  %v65_v42 = vld [vmem:[#allocation2 + $0x150] sm:$0xff]  ;;  %v66_v43 = vld [vmem:[#allocation2 + $0x158] sm:$0xff] }
  0x29   :  { %v67_v44 = vld [vmem:[#allocation2 + $0x160] sm:$0xff]  ;;  %129 = vst [vmem:[#allocation5 + $0x150] sm:$0xff] %v65_v42  ;;  %130 = vst [vmem:[#allocation5 + $0x158] sm:$0xff] %v66_v43  ;;  %v68_v45 = vld [vmem:[#allocation2 + $0x168] sm:$0xff] }
  0x2a   :  { %131 = vst [vmem:[#allocation5 + $0x160] sm:$0xff] %v67_v44  ;;  %v69_v46 = vld [vmem:[#allocation2 + $0x170] sm:$0xff]  ;;  %v70_v47 = vld [vmem:[#allocation2 + $0x178] sm:$0xff]  ;;  %132 = vst [vmem:[#allocation5 + $0x168] sm:$0xff] %v68_v45 }
  0x2b   :  { %133 = vst [vmem:[#allocation5 + $0x170] sm:$0xff] %v69_v46  ;;  %134 = vst [vmem:[#allocation5 + $0x178] sm:$0xff] %v70_v47  ;;  %v71_v48 = vld [vmem:[#allocation2 + $0x180] sm:$0xff]  ;;  %v72_v49 = vld [vmem:[#allocation2 + $0x188] sm:$0xff] }
  0x2c   :  { %v73_v50 = vld [vmem:[#allocation2 + $0x190] sm:$0xff]  ;;  %135 = vst [vmem:[#allocation5 + $0x180] sm:$0xff] %v71_v48  ;;  %136 = vst [vmem:[#allocation5 + $0x188] sm:$0xff] %v72_v49  ;;  %v74_v51 = vld [vmem:[#allocation2 + $0x198] sm:$0xff] }
  0x2d   :  { %137 = vst [vmem:[#allocation5 + $0x190] sm:$0xff] %v73_v50  ;;  %v75_v52 = vld [vmem:[#allocation2 + $0x1a0] sm:$0xff]  ;;  %v76_v53 = vld [vmem:[#allocation2 + $0x1a8] sm:$0xff]  ;;  %138 = vst [vmem:[#allocation5 + $0x198] sm:$0xff] %v74_v51 }
  0x2e   :  { %139 = vst [vmem:[#allocation5 + $0x1a0] sm:$0xff] %v75_v52  ;;  %140 = vst [vmem:[#allocation5 + $0x1a8] sm:$0xff] %v76_v53  ;;  %v77_v54 = vld [vmem:[#allocation2 + $0x1b0] sm:$0xff]  ;;  %v78_v55 = vld [vmem:[#allocation2 + $0x1b8] sm:$0xff] }
  0x2f   :  { %v79_v56 = vld [vmem:[#allocation2 + $0x1c0] sm:$0xff]  ;;  %141 = vst [vmem:[#allocation5 + $0x1b0] sm:$0xff] %v77_v54  ;;  %142 = vst [vmem:[#allocation5 + $0x1b8] sm:$0xff] %v78_v55  ;;  %v80_v57 = vld [vmem:[#allocation2 + $0x1c8] sm:$0xff] }
  0x30   :  { %143 = vst [vmem:[#allocation5 + $0x1c0] sm:$0xff] %v79_v56  ;;  %v81_v58 = vld [vmem:[#allocation2 + $0x1d0] sm:$0xff]  ;;  %v82_v59 = vld [vmem:[#allocation2 + $0x1d8] sm:$0xff]  ;;  %144 = vst [vmem:[#allocation5 + $0x1c8] sm:$0xff] %v80_v57 }
  0x31   :  { %145 = vst [vmem:[#allocation5 + $0x1d0] sm:$0xff] %v81_v58  ;;  %146 = vst [vmem:[#allocation5 + $0x1d8] sm:$0xff] %v82_v59  ;;  %v83_v60 = vld [vmem:[#allocation2 + $0x1e0] sm:$0xff]  ;;  %v84_v61 = vld [vmem:[#allocation2 + $0x1e8] sm:$0xff] }
  0x32   :  { %v85_v62 = vld [vmem:[#allocation2 + $0x1f0] sm:$0xff]  ;;  %147 = vst [vmem:[#allocation5 + $0x1e0] sm:$0xff] %v83_v60  ;;  %148 = vst [vmem:[#allocation5 + $0x1e8] sm:$0xff] %v84_v61  ;;  %v86_v63 = vld [vmem:[#allocation2 + $0x1f8] sm:$0xff] }
  0x33   :  { %149 = vst [vmem:[#allocation5 + $0x1f0] sm:$0xff] %v85_v62  ;;  %150 = vst [vmem:[#allocation5 + $0x1f8] sm:$0xff] %v86_v63 }
  0x34   :  { %205 = shalt.err (!%p202_p12)
}
  0x35   :  { %s206_s24 = scalar_lea.hbm %s265_s1, 8192 }
  0x36   :  { %p207_p13 = scmp.ne.s32.totalorder %s265_s1, %s206_s24  ;;  %p210_p0 = scmp.lt.u32.totalorder %s206_s24, %s265_s1 }
  0x38   :  { %p212_p1 = pnand %p210_p0, %p207_p13 }
  0x3a   :  { %215 = shalt.err (!%p212_p1)
}
  0x3b   :  { %162 = dma.vmem_to_hbm [thread:$0]  %s157_s20, 8192, %s265_s1, [#allocation4], %s221_s16, %s221_s16, %s222_s17  }
  0x3c   :  { %218 = dma.done.wait [#allocation4], 8192  }
  0x3d   :  { %219 = vsyncadd [#allocation4], 4294959104 }
  0x3e   :  { %166 = vsyncpa [#allocation3], 1 }
  0x3f   :  { %167 = vsyncpa [#allocation4], 1 }

</bundles_post_ra>
